<compile_context>
chip_gen: v6e
topology: v6e:2x2x1
jax: 0.10.0
libtpu: 0.0.40
codegen_flags: <defaults>
</compile_context>

<pallas_src>
import jax
import jax.numpy as jnp
from jax.experimental import pallas as pl
from jax.experimental.pallas import tpu as pltpu


def swish_kernel(x_ref, o_ref):
    # Elementwise on the whole VMEM tile.  Compute in f32 (handles bf16 input)
    # using the tanh form of the logistic: x*sigmoid(x) = 0.5*x*(tanh(x/2)+1),
    # which is a single EUP transcendental per element.
    x = x_ref[...].astype(jnp.float32)
    y = 0.5 * x * (jnp.tanh(0.5 * x) + 1.0)
    o_ref[...] = y.astype(o_ref.dtype)


def swish(x, *, min_pallas_elems=64 * 1024, force_pallas=False):
    """Swish / SiLU (x * sigmoid(x)) elementwise via a Pallas TPU kernel.

    x: any-shape float array (e.g. [B, C, H, W], matching the PyTorch module).
    """
    orig_shape = x.shape
    orig_dtype = x.dtype
    n = int(x.size)

    if n == 0:
        return x

    # Small-input fast path: XLA fuses this for free; kernel overhead dominates.
    if (not force_pallas) and n < min_pallas_elems:
        xf = x.astype(jnp.float32)
        return (xf * jax.nn.sigmoid(xf)).astype(orig_dtype)

    flat = x.reshape(-1)

    # Pick the largest lane-dense width that divides n exactly (no pad/slice).
    cols = None
    for c in (4096, 2048, 1024, 512, 256, 128):
        if n % c == 0:
            cols = c
            break

    needs_slice = False
    if cols is None:
        # Rare fallback: element count not a multiple of 128 -> pad + slice.
        cols = 1024
        rows = pl.cdiv(n, cols)
        padded_n = rows * cols
        flat = jnp.pad(flat, (0, padded_n - n))
        needs_slice = True
    else:
        rows = n // cols

    x2d = flat.reshape(rows, cols)
    itemsize = jnp.dtype(orig_dtype).itemsize

    # Block sizing in bytes: ~4 MiB of input traffic per block, rows mult. of 8.
    target_block_bytes = 4 * 1024 * 1024
    max_block_rows = max(8, (target_block_bytes // (cols * itemsize)) // 8 * 8)

    if rows <= 8:
        # Single tiny block covering the whole array (block == full dims).
        block_rows = rows
    else:
        # Aim for >= 8 blocks so the 2 v7x TensorCores split work evenly,
        # but never exceed the byte-sized block cap.
        cap_for_grid = max(8, (pl.cdiv(rows, 8) // 8) * 8)
        block_rows = min(max_block_rows, cap_for_grid)

    grid_rows = pl.cdiv(rows, block_rows)
    n_proc = rows * cols

    out2d = pl.pallas_call(
        swish_kernel,
        out_shape=jax.ShapeDtypeStruct((rows, cols), orig_dtype),
        grid=(grid_rows,),
        in_specs=[pl.BlockSpec((block_rows, cols), lambda i: (i, 0))],
        out_specs=pl.BlockSpec((block_rows, cols), lambda i: (i, 0)),
        compiler_params=pltpu.CompilerParams(
            dimension_semantics=("parallel",),
        ),
        cost_estimate=pl.CostEstimate(
            flops=3 * n_proc,            # mul + add + mul per element
            transcendentals=n_proc,      # one tanh per element
            bytes_accessed=2 * n_proc * itemsize,
        ),
    )(x2d)

    if needs_slice:
        return out2d.reshape(-1)[:n].reshape(orig_shape)
    return out2d.reshape(orig_shape)


if __name__ == "__main__":
    key = jax.random.PRNGKey(0)

    # Shape implied by the PyTorch module usage: (B, C, H, W) = (2, 4, 16, 16).
    x = jax.random.normal(key, (2, 4, 16, 16), dtype=jnp.float32)
    ref = x * jax.nn.sigmoid(x)

    # 1) Force the Pallas path on the small test input so the kernel runs.
    y = swish(x, force_pallas=True)
    jax.block_until_ready(y)
    assert y.shape == x.shape and y.dtype == x.dtype
    assert jnp.allclose(y, ref, atol=1e-5, rtol=1e-5)

    # 2) Default path for tiny inputs (plain-JAX fast path).
    y_fast = swish(x)
    jax.block_until_ready(y_fast)
    assert jnp.allclose(y_fast, ref, atol=1e-5, rtol=1e-5)

    # 3) A larger, 128-aligned input that takes the multi-block Pallas path.
    x_big = jax.random.normal(jax.random.PRNGKey(0), (8, 16, 64, 64),
                              dtype=jnp.float32)
    y_big = swish(x_big)
    jax.block_until_ready(y_big)
    assert jnp.allclose(y_big, x_big * jax.nn.sigmoid(x_big),
                        atol=1e-5, rtol=1e-5)

    # 4) A misaligned size to exercise the rare pad + slice fallback.
    x_odd = jax.random.normal(jax.random.PRNGKey(0), (2, 3, 37, 13),
                              dtype=jnp.float32)
    y_odd = swish(x_odd, force_pallas=True)
    jax.block_until_ready(y_odd)
    assert y_odd.shape == x_odd.shape
    assert jnp.allclose(y_odd, x_odd * jax.nn.sigmoid(x_odd),
                        atol=1e-5, rtol=1e-5)

    print("KERNEL_OK")
</pallas_src>

<mosaic_0001>
module attributes {stable_mosaic.version = 11 : i64} {
  func.func @swish_kernel(%arg0: i32, %arg1: memref<1x2048xf32, #tpu.memory_space<vmem>>, %arg2: memref<1x2048xf32, #tpu.memory_space<vmem>>) attributes {dimension_semantics = [#tpu.dimension_semantics<parallel>], iteration_bounds = array<i64: 1>, scalar_prefetch = 0 : i64, scratch_operands = 0 : i64, tpu.core_type = #tpu.core_type<tc>, window_params = [{transform_indices = @transform_0, window_bounds = array<i64: 1, 2048>}, {transform_indices = @transform_1, window_bounds = array<i64: 1, 2048>}]} {
    %c0 = arith.constant 0 : index
    %c0_0 = arith.constant 0 : index
    %0 = vector.load %arg1[%c0, %c0_0] : memref<1x2048xf32, #tpu.memory_space<vmem>>, vector<1x2048xf32>
    %cst = arith.constant 5.000000e-01 : f32
    %1 = vector.broadcast %cst : f32 to vector<1x2048xf32>
    %2 = arith.mulf %1, %0 : vector<1x2048xf32>
    %cst_1 = arith.constant 5.000000e-01 : f32
    %3 = vector.broadcast %cst_1 : f32 to vector<1x2048xf32>
    %4 = arith.mulf %3, %0 : vector<1x2048xf32>
    %5 = math.tanh %4 : vector<1x2048xf32>
    %cst_2 = arith.constant 1.000000e+00 : f32
    %6 = vector.broadcast %cst_2 : f32 to vector<1x2048xf32>
    %7 = arith.addf %5, %6 : vector<1x2048xf32>
    %8 = arith.mulf %2, %7 : vector<1x2048xf32>
    %c0_3 = arith.constant 0 : index
    %c0_4 = arith.constant 0 : index
    %9 = vector.load %arg2[%c0_3, %c0_4] : memref<1x2048xf32, #tpu.memory_space<vmem>>, vector<1x2048xf32>
    tpu.vector_store %arg2[%c0_3, %c0_4], %8 {strides = array<i32>} : memref<1x2048xf32, #tpu.memory_space<vmem>>, vector<1x2048xf32>,
    return
  }
  func.func @transform_0(%arg0: i32) -> (i32, i32) {
    %c0_i32 = arith.constant 0 : i32
    %c0_i32_0 = arith.constant 0 : i32
    return %arg0, %c0_i32 : i32, i32
  }
  func.func @transform_1(%arg0: i32) -> (i32, i32) {
    %c0_i32 = arith.constant 0 : i32
    %c0_i32_0 = arith.constant 0 : i32
    return %arg0, %c0_i32 : i32, i32
  }
}

</mosaic_0001>

<bundles_post_ra>
// kernel: tpu_custom_call.1
= control target key start
LH: loop header
LB: loop body
LE: loop exit
PB: predicated region body
PF: predicated region fallthrough
CT: control target
= control target key end

     0   :  { %6 = vsyncpa [#allocation3], 0  ;;  %s116_s0 = inlined_call_operand.hbm [shape: f32[1,2048], index: 0, kind: input, shape index: {}]   ;;  %s117_s1 = inlined_call_operand.hbm [shape: f32[1,2048], index: 1, kind: output, shape index: {}]  }
   0x1   :  { %7 = vsyncpa [#allocation4], 0  ;;  %s98_s6 = smov [#allocation2]  }
   0x2   :  { %s14_s7 = sshll.u32 %s98_s6, 4  ;;  %s15_s7 = int_to_ptr.vmem [resolvable:$true] %s14_s7 }
   0x3   :  { %s62_s8 = scalar_lea.vmem %s15_s7, 256  ;;  %p67_p1 = scmp.lt.s32.totalorder %s15_s7, %s15_s7 }
   0x4   :  { %p63_p0 = scmp.ne.s32.totalorder %s15_s7, %s62_s8  ;;  %p68_p2 = scmp.lt.s32.totalorder %s62_s8, %s62_s8 }
   0x6   :  { %p69_p3 = por %p68_p2, %p67_p1 }
   0x8   :  { %p70_p4 = pnand %p69_p3, %p63_p0 }
   0xa   :  { %73 = shalt.err (!%p70_p4)
}
   0xb   :  { %17 = dma.hbm_to_vmem [thread:$0]  %s116_s0, 256, %s15_s7, [#allocation3]  }
   0xc   :  { %94 = dma.done.wait [#allocation3], 256  }
   0xd   :  { %95 = vsyncadd [#allocation3], 4294967040  ;;  %v21_v0 = vld [vmem:[#allocation2] sm:$0xff]  ;;  %v22_v1 = vld [vmem:[#allocation2 + $0x8] sm:$0xff]  ;;  %s99_s11 = smov [#allocation5]  }
   0xe   :  { %v23_v2 = vmul.f32 0.5, %v21_v0  ;;  %v24_v3 = vmul.f32 0.5, %v22_v1  ;;  %s39_s12 = sshll.u32 %s99_s11, 4  ;;  %s40_s12 = int_to_ptr.vmem [resolvable:$true] %s39_s12 }
   0xf   :  { %s74_s0 = scalar_lea.vmem %s40_s12, 256  ;;  %p79_p6 = scmp.lt.s32.totalorder %s40_s12, %s40_s12 }
  0x10   :  { %50 = vtanh.f32 %v23_v2  ;;  %p75_p5 = scmp.ne.s32.totalorder %s40_s12, %s74_s0  ;;  %p80_p7 = scmp.lt.s32.totalorder %s74_s0, %s74_s0 }
  0x11   :  { %52 = vtanh.f32 %v24_v3 }
  0x12   :  { %p81_p8 = por %p80_p7, %p79_p6 }
  0x14   :  { %p82_p9 = pnand %p81_p8, %p75_p5 }
  0x1d   :  { %v51_v4 = vpop.eup %50 }
  0x1e   :  { %v53_v5 = vpop.eup %52  ;;  %v27_v6 = vadd.f32 1.0, %v51_v4 }
  0x1f   :  { %v28_v7 = vadd.f32 1.0, %v53_v5 }
  0x20   :  { %v29_v8 = vmul.f32 %v27_v6, %v23_v2 }
  0x21   :  { %v30_v9 = vmul.f32 %v28_v7, %v24_v3 }
  0x22   :  { %31 = vst [vmem:[#allocation5] sm:$0xff] %v29_v8 }
  0x23   :  { %32 = vst [vmem:[#allocation5 + $0x8] sm:$0xff] %v30_v9 }
  0x24   :  { %85 = shalt.err (!%p82_p9)
}
  0x25   :  { %42 = dma.vmem_to_hbm [thread:$0]  %s40_s12, 256, %s117_s1, [#allocation4]  }
  0x26   :  { %96 = dma.done.wait [#allocation4], 256  }
  0x27   :  { %97 = vsyncadd [#allocation4], 4294967040 }
  0x28   :  { %46 = vsyncpa [#allocation3], 1 }
  0x29   :  { %47 = vsyncpa [#allocation4], 1 }

</bundles_post_ra>
